<compile_context>
chip_gen: v6e
topology: v6e:2x2x1
jax: 0.10.0
libtpu: 0.0.40
codegen_flags: <defaults>
</compile_context>

<pallas_src>
import functools

import jax
import jax.numpy as jnp
from jax import lax
from jax.experimental import pallas as pl
from jax.experimental.pallas import tpu as pltpu


def _layernorm_kernel(x_ref, w_ref, b_ref, o_ref, *, eps, inv_c):
    # x_ref: (BB, C, TILE_T)  w_ref/b_ref: (1, C, 1)  o_ref: (BB, C, TILE_T)
    x = x_ref[...].astype(jnp.float32)
    mu = jnp.sum(x, axis=1, keepdims=True) * inv_c            # (BB, 1, TILE_T)
    res = x - mu
    var = jnp.sum(res * res, axis=1, keepdims=True) * inv_c   # (BB, 1, TILE_T)
    inv_std = lax.rsqrt(var + eps)                            # EUP, tiny tensor
    out = res * inv_std
    out = out * w_ref[...].astype(jnp.float32) + b_ref[...].astype(jnp.float32)
    o_ref[...] = out.astype(o_ref.dtype)


def _vmem_capacity_bytes():
    try:
        return int(pltpu.get_tpu_info().vmem_capacity_bytes)
    except Exception:
        return 128 << 20  # v5e/v6e physical; conservative fallback


def _select_tiling(B, C, T_pad, itemsize):
    """Pick (BB, TILE_T, vmem_limit_bytes).  T_pad is a multiple of 128."""
    vmem_cap = _vmem_capacity_bytes()
    # Per-generation knobs: v7x has only 64 MiB VMEM (tighter budget) but
    # ~3.2 TB/s HBM, so the fixed per-step overhead costs more -> larger
    # target per-step HBM transfer.
    budget = min(vmem_cap // 4, 32 << 20)
    target_step_hbm = (4 << 20) if vmem_cap <= (64 << 20) else (2 << 20)

    # Footprint per block element:
    #   in + out, double-buffered, HBM dtype -> 4 * itemsize
    #   ~3 f32 intermediates (x, res, out)   -> 12 bytes
    per_elem_vmem = 4 * itemsize + 3 * 4
    per_elem_hbm = 2 * itemsize

    # Largest TILE_T (multiple of 128, dividing T_pad) within the budget, BB=1.
    max_tile_t = max(128, ((budget // per_elem_vmem) // max(C, 1)) // 128 * 128)
    tile_t = 128
    t = 256
    while t <= T_pad:
        if T_pad % t == 0 and t <= max_tile_t:
            tile_t = t
        t += 128

    # If one batch row already covers all of T and the step is still small
    # (small C), block multiple batch rows per step to amortize step overhead.
    bb = 1
    if tile_t == T_pad:
        for cand in range(2, B + 1):
            if B % cand != 0:
                continue
            if cand * C * tile_t * per_elem_vmem > budget:
                break
            if bb * C * tile_t * per_elem_hbm >= target_step_hbm:
                break
            bb = cand

    # Keep >= 2 grid steps when possible so v7x's 2 TensorCores both get work.
    num_t = T_pad // tile_t
    if (B // bb) * num_t < 2:
        if bb > 1:
            for cand in range(bb - 1, 0, -1):
                if B % cand == 0 and (B // cand) >= 2:
                    bb = cand
                    break
        elif tile_t % 256 == 0:
            tile_t //= 2

    footprint = bb * C * tile_t * per_elem_vmem + 4 * C * itemsize  # + w/b
    vmem_limit = int(min(max(footprint * 5 // 4 + (2 << 20), 16 << 20),
                         vmem_cap - (4 << 20)))
    return bb, tile_t, vmem_limit


def layer_norm_bct(x, weight, bias, eps=1e-5):
    """x: (B, C, T); weight/bias: (1, C, 1). Returns (B, C, T)."""
    B, C, T = x.shape
    assert weight.shape == (1, C, 1) and bias.shape == (1, C, 1)
    itemsize = jnp.dtype(x.dtype).itemsize

    # Pad T to a multiple of 128: keeps every output tile lane-dense
    # (unmasked stores) and keeps the tile-size search independent of T's
    # divisibility. Each time position is normalized independently, so the
    # padded columns never affect the real ones; they are sliced off below.
    T_pad = ((T + 127) // 128) * 128
    x_p = x if T_pad == T else jnp.pad(x, ((0, 0), (0, 0), (0, T_pad - T)))

    bb, tile_t, vmem_limit = _select_tiling(B, C, T_pad, itemsize)
    grid = (B // bb, T_pad // tile_t)
    inv_c = 1.0 / float(C)

    kernel = functools.partial(_layernorm_kernel, eps=float(eps), inv_c=inv_c)

    cost = pl.CostEstimate(
        flops=8 * B * C * T_pad,
        transcendentals=B * T_pad,
        bytes_accessed=2 * B * C * T_pad * itemsize + 8 * C * itemsize,
    )

    out = pl.pallas_call(
        kernel,
        out_shape=jax.ShapeDtypeStruct((B, C, T_pad), x.dtype),
        grid_spec=pltpu.PrefetchScalarGridSpec(
            num_scalar_prefetch=0,
            grid=grid,
            in_specs=[
                pl.BlockSpec((bb, C, tile_t), lambda b, t: (b, 0, t)),
                pl.BlockSpec((1, C, 1), lambda b, t: (0, 0, 0)),
                pl.BlockSpec((1, C, 1), lambda b, t: (0, 0, 0)),
            ],
            out_specs=pl.BlockSpec((bb, C, tile_t), lambda b, t: (b, 0, t)),
        ),
        compiler_params=pltpu.CompilerParams(
            dimension_semantics=("parallel", "parallel"),
            vmem_limit_bytes=vmem_limit,
        ),
        cost_estimate=cost,
    )(x_p, weight, bias)

    return out if T_pad == T else out[:, :, :T]


def _ref_layernorm(x, w, b, eps):
    mu = jnp.mean(x, axis=1, keepdims=True)
    res = x - mu
    sigma = jnp.mean(res ** 2, axis=1, keepdims=True)
    return res / jnp.sqrt(sigma + eps) * w + b


if __name__ == "__main__":
    eps = 1e-5

    # Small shape consistent with the module's forward (B, C, T).
    B, C, T = 2, 4, 16
    x = jax.random.normal(jax.random.PRNGKey(0), (B, C, T), dtype=jnp.float32)
    weight = jnp.ones((1, C, 1), dtype=jnp.float32)   # nn.Parameter(torch.ones)
    bias = jnp.zeros((1, C, 1), dtype=jnp.float32)    # nn.Parameter(torch.zeros)

    out = layer_norm_bct(x, weight, bias, eps=eps)
    jax.block_until_ready(out)
    assert jnp.allclose(out, _ref_layernorm(x, weight, bias, eps),
                        atol=1e-5, rtol=1e-5)

    # Tile-exercising shape (T multiple of 128, larger C).
    B2, C2, T2 = 2, 32, 512
    x2 = jax.random.normal(jax.random.PRNGKey(1), (B2, C2, T2), dtype=jnp.float32)
    w2 = jnp.ones((1, C2, 1), dtype=jnp.float32)
    b2 = jnp.zeros((1, C2, 1), dtype=jnp.float32)
    out2 = layer_norm_bct(x2, w2, b2, eps=eps)
    jax.block_until_ready(out2)
    assert jnp.allclose(out2, _ref_layernorm(x2, w2, b2, eps),
                        atol=1e-5, rtol=1e-5)

    # Non-128-divisible T exercises the padded remainder path.
    B3, C3, T3 = 2, 8, 200
    x3 = jax.random.normal(jax.random.PRNGKey(2), (B3, C3, T3), dtype=jnp.float32)
    w3 = jnp.ones((1, C3, 1), dtype=jnp.float32)
    b3 = jnp.zeros((1, C3, 1), dtype=jnp.float32)
    out3 = layer_norm_bct(x3, w3, b3, eps=eps)
    jax.block_until_ready(out3)
    assert out3.shape == (B3, C3, T3)
    assert jnp.allclose(out3, _ref_layernorm(x3, w3, b3, eps),
                        atol=1e-5, rtol=1e-5)

    print("KERNEL_OK")
</pallas_src>

<mosaic_0001>
module attributes {stable_mosaic.version = 11 : i64} {
  func.func @_layernorm_kernel(%arg0: i32, %arg1: i32, %arg2: memref<1x4x128xf32, #tpu.memory_space<vmem>>, %arg3: memref<1x4x1xf32, #tpu.memory_space<vmem>>, %arg4: memref<1x4x1xf32, #tpu.memory_space<vmem>>, %arg5: memref<1x4x128xf32, #tpu.memory_space<vmem>>) attributes {dimension_semantics = [#tpu.dimension_semantics<parallel>, #tpu.dimension_semantics<parallel>], iteration_bounds = array<i64: 2, 1>, scalar_prefetch = 0 : i64, scratch_operands = 0 : i64, tpu.core_type = #tpu.core_type<tc>, window_params = [{transform_indices = @transform_0, window_bounds = array<i64: 1, 4, 128>}, {pipeline_mode = #tpu.pipeline_mode<synchronous>, transform_indices = @transform_1, window_bounds = array<i64: 1, 4, 1>}, {pipeline_mode = #tpu.pipeline_mode<synchronous>, transform_indices = @transform_2, window_bounds = array<i64: 1, 4, 1>}, {transform_indices = @transform_3, window_bounds = array<i64: 1, 4, 128>}]} {
    %c0 = arith.constant 0 : index
    %c0_0 = arith.constant 0 : index
    %c0_1 = arith.constant 0 : index
    %0 = vector.load %arg2[%c0, %c0_0, %c0_1] : memref<1x4x128xf32, #tpu.memory_space<vmem>>, vector<1x4x128xf32>
    %cst = arith.constant dense<0.000000e+00> : vector<1x128xf32>
    %1 = vector.multi_reduction <add>, %0, %cst [1] : vector<1x4x128xf32> to vector<1x128xf32>
    %2 = vector.shape_cast %1 : vector<1x128xf32> to vector<1x1x128xf32>
    %cst_2 = arith.constant 2.500000e-01 : f32
    %3 = vector.broadcast %cst_2 : f32 to vector<1x1x128xf32>
    %4 = arith.mulf %2, %3 : vector<1x1x128xf32>
    %5 = vector.broadcast %4 : vector<1x1x128xf32> to vector<1x4x128xf32>
    %6 = arith.subf %0, %5 : vector<1x4x128xf32>
    %7 = arith.mulf %6, %6 : vector<1x4x128xf32>
    %cst_3 = arith.constant dense<0.000000e+00> : vector<1x128xf32>
    %8 = vector.multi_reduction <add>, %7, %cst_3 [1] : vector<1x4x128xf32> to vector<1x128xf32>
    %9 = vector.shape_cast %8 : vector<1x128xf32> to vector<1x1x128xf32>
    %cst_4 = arith.constant 2.500000e-01 : f32
    %10 = vector.broadcast %cst_4 : f32 to vector<1x1x128xf32>
    %11 = arith.mulf %9, %10 : vector<1x1x128xf32>
    %cst_5 = arith.constant 9.99999974E-6 : f32
    %12 = vector.broadcast %cst_5 : f32 to vector<1x1x128xf32>
    %13 = arith.addf %11, %12 : vector<1x1x128xf32>
    %14 = math.rsqrt %13 : vector<1x1x128xf32>
    %15 = vector.broadcast %14 : vector<1x1x128xf32> to vector<1x4x128xf32>
    %16 = arith.mulf %6, %15 : vector<1x4x128xf32>
    %c0_6 = arith.constant 0 : index
    %c0_7 = arith.constant 0 : index
    %c0_8 = arith.constant 0 : index
    %17 = vector.load %arg3[%c0_6, %c0_7, %c0_8] : memref<1x4x1xf32, #tpu.memory_space<vmem>>, vector<1x4x1xf32>
    %18 = vector.broadcast %17 : vector<1x4x1xf32> to vector<1x4x128xf32>
    %19 = arith.mulf %16, %18 : vector<1x4x128xf32>
    %c0_9 = arith.constant 0 : index
    %c0_10 = arith.constant 0 : index
    %c0_11 = arith.constant 0 : index
    %20 = vector.load %arg4[%c0_9, %c0_10, %c0_11] : memref<1x4x1xf32, #tpu.memory_space<vmem>>, vector<1x4x1xf32>
    %21 = vector.broadcast %20 : vector<1x4x1xf32> to vector<1x4x128xf32>
    %22 = arith.addf %19, %21 : vector<1x4x128xf32>
    %c0_12 = arith.constant 0 : index
    %c0_13 = arith.constant 0 : index
    %c0_14 = arith.constant 0 : index
    %23 = vector.load %arg5[%c0_12, %c0_13, %c0_14] : memref<1x4x128xf32, #tpu.memory_space<vmem>>, vector<1x4x128xf32>
    tpu.vector_store %arg5[%c0_12, %c0_13, %c0_14], %22 {strides = array<i32>} : memref<1x4x128xf32, #tpu.memory_space<vmem>>, vector<1x4x128xf32>,
    return
  }
  func.func @transform_0(%arg0: i32, %arg1: i32) -> (i32, i32, i32) {
    %c0_i32 = arith.constant 0 : i32
    %c0_i32_0 = arith.constant 0 : i32
    return %arg0, %c0_i32, %arg1 : i32, i32, i32
  }
  func.func @transform_1(%arg0: i32, %arg1: i32) -> (i32, i32, i32) {
    %c0_i32 = arith.constant 0 : i32
    %c0_i32_0 = arith.constant 0 : i32
    %c0_i32_1 = arith.constant 0 : i32
    %c0_i32_2 = arith.constant 0 : i32
    return %c0_i32, %c0_i32_0, %c0_i32_1 : i32, i32, i32
  }
  func.func @transform_2(%arg0: i32, %arg1: i32) -> (i32, i32, i32) {
    %c0_i32 = arith.constant 0 : i32
    %c0_i32_0 = arith.constant 0 : i32
    %c0_i32_1 = arith.constant 0 : i32
    %c0_i32_2 = arith.constant 0 : i32
    return %c0_i32, %c0_i32_0, %c0_i32_1 : i32, i32, i32
  }
  func.func @transform_3(%arg0: i32, %arg1: i32) -> (i32, i32, i32) {
    %c0_i32 = arith.constant 0 : i32
    %c0_i32_0 = arith.constant 0 : i32
    return %arg0, %c0_i32, %arg1 : i32, i32, i32
  }
}

</mosaic_0001>

<bundles_post_ra>
// kernel: tpu_custom_call.1
= control target key start
LH: loop header
LB: loop body
LE: loop exit
PB: predicated region body
PF: predicated region fallthrough
CT: control target
= control target key end

     0   :  { %8 = vsyncpa [#allocation3], 0  ;;  %s590_s0 = inlined_call_operand.vmem [shape: f32[2,4,128], index: 0, kind: input, shape index: {}]   ;;  %s591_s1 = inlined_call_operand.vmem [shape: f32[1,4,1], index: 1, kind: input, shape index: {}]   ;;  %s592_s2 = inlined_call_operand.vmem [shape: f32[1,4,1], index: 2, kind: input, shape index: {}]   ;;  %s593_s3 = inlined_call_operand.hbm [shape: f32[2,4,128], index: 3, kind: output, shape index: {}]  }
   0x1   :  { %10 = vsyncpa [#allocation3 + $0x1], 0  ;;  %s485_s12 = smov 0   ;;  %s487_s13 = smov 0  }
   0x2   :  { %s489_s14 = smov 0   ;;  %s491_s15 = smov 0  }
   0x3   :  { %s493_s16 = smov 0   ;;  %s495_s17 = smov 0  }
   0x4 LB: > { %s315_s18 = sadd.s32 4294967295, %s461_s17   ;;  %s316_s19 = sadd.s32 4294967294, %s461_s17   ;;  %s461_s17 = sphi %s495_s17, %s16_s17   ;;  %s457_s16 = sphi %s493_s16, %s600_s16   ;;  %s453_s15 = sphi %s491_s15, %s599_s15   ;;  %s449_s14 = sphi %s489_s14, %s598_s14   ;;  %s445_s13 = sphi %s487_s13, %s597_s13   ;;  %s441_s12 = sphi %s485_s12, %s596_s12  }
   0x5   : > { %s28_s20 = sadd.s32 1, %s457_s16  ;;  %s107_s21 = sadd.s32 1, %s449_s14 }
   0x6   : > { %p30_p0 = scmp.ge.s32.totalorder %s28_s20, 2  ;;  %p117_p1 = scmp.ne.s32.totalorder %s449_s14, %s445_s13 }
   0x7   : > { %p118_p2 = scmp.eq.s32.totalorder %s315_s18, 1  ;;  %p123_p3 = scmp.ne.s32.totalorder %s445_s13, %s441_s12 }
   0x8   : > { %s602_s20 = smov (%p30_p0, %s28_s20), 0  ;;  %p124_p5 = scmp.eq.s32.totalorder %s316_s19, 1 }
   0x9   : > { %p525_p4 = por %p118_p2, %p117_p1  ;;  %s102_s23 = ssub.s32 %s457_s16, %s602_s20 }
   0xa   : > { %p319_p6 = scmp.ge.s32.totalorder %s461_s17, 1  ;;  %p105_p7 = scmp.eq.s32.totalorder %s102_s23, 0 }
   0xb   : > { %p532_p8 = por %p124_p5, %p123_p3  ;;  %p158_p9 = scmp.lt.s32.totalorder %s461_s17, 3 }
   0xc   : > { %s538_s25 = scalar_select %p105_p7, %s449_s14, %s107_s21  }
   0xd   : > { %p159_p10 = pnand %p319_p6, %p158_p9 }
   0xe   : > { %p184_p11 = scmp.lt.s32.totalorder (!%p159_p10), %s453_s15, 1  ;;  %s181_s8 = sand.u32 (!%p159_p10), 1, %s445_s13  }
   0xf   : > { %162 = sbr.rel (%p159_p10) target bundleno = 165 (0xa5), region = 32  ;;  %s320_s9 = sshll.u32 (!%p159_p10), %s181_s8, 2 }
  0x10   : > { %s323_s10 = sshll.u32 (!%p159_p10), %s453_s15, 6  ;;  %s183_s11 = scalar_lea.vmem (!%p159_p10), [#allocation2], %s320_s9 }
  0x11   : > { %s244_s18 = sshll.u32 (!%p159_p10), %s183_s11, 4  ;;  %s242_s23 = scalar_lea.hbm (!%p159_p10), %s593_s3, %s323_s10  ;;  %s245_s18 = int_to_ptr.vmem [resolvable:$true] %s244_s18 }
  0x12   : > { %s230_s26 = scalar_lea.sflag (!%p159_p10), [#allocation3], %s181_s8  ;;  %s385_s27 = scalar_lea.vmem (!%p159_p10), %s245_s18, 64 }
  0x13   : > { %p386_p12 = scmp.ne.s32.totalorder (!%p159_p10), %s245_s18, %s385_s27  ;;  %s464_s28 = smov (!%p159_p10), [#allocation2]  }
  0x14   : > { %v214_v0 = vld [vmem:[%s591_s1] sm:$0xf]  ;;  %v463_v1 = vmov 0   ;;  %s185_s30 = scalar_select %p184_p11, %s453_s15, 1  ;;  %vm192_vm0 = vcmask 1043456  }
  0x15   : > { %382 = vset.pattern.permute.xlu0 %v463_v1  ;;  %v221_v2 = vld [vmem:[%s592_s2] sm:$0xf]  ;;  %p387_p13 = pnand %p386_p12, %p525_p4  ;;  %s389_s29 = sshll.u32 %s464_s28, 4  ;;  %s390_s29 = int_to_ptr.vmem [resolvable:$false] %s389_s29 }
  0x16   : > { %217 = vperm.xlu0 %382, %v214_v0   ;;  %s321_s4 = sshll.u32 %s185_s30, 2  ;;  %s391_s15 = scalar_lea.vmem %s390_s29, 128 }
  0x17   : > { %s190_s7 = scalar_lea.vmem %s590_s0, %s321_s4  ;;  %p388_p0 = pneg %p387_p13 }
  0x18   : > { %v191_v3 = vld [vmem:[%s190_s7] sm:$0xf]  ;;  %p392_p1 = scmp.lt.s32.totalorder %s245_s18, %s390_s29  ;;  %p393_p2 = scmp.lt.s32.totalorder %s391_s15, %s385_s27 }
  0x19   : > { %v193_v4 = vsel %vm192_vm0, %v191_v3, 0.0 }
  0x1a   : > { %224 = vperm.xlu0 %382, %v221_v2   ;;  %v194_v5 = vrot.slane %v193_v4, 4  ;;  %p394_p3 = por %p393_p2, %p392_p1 }
  0x1c   : > { %v195_v6 = vadd.f32 %v194_v5, %v193_v4  ;;  %p395_p5 = pnand %p394_p3, %p388_p0 }
  0x1e   : > { %v196_v7 = vrot.slane %v195_v6, 2 }
  0x20   : > { %v197_v8 = vadd.f32 %v196_v7, %v195_v6 }
  0x22   : > { %v198_v9 = vrot.slane %v197_v8, 1 }
  0x24   : > { %v199_v10 = vadd.f32 %v198_v9, %v197_v8 }
  0x26   : > { %v200_v11 = vmul.f32 0.25, %v199_v10 }
  0x28   : > { %v201_v12 = vsub.f32 %v191_v3, %v200_v11 }
  0x2a   : > { %v202_v13 = vmul.f32 %v201_v12, %v201_v12 }
  0x2c   : > { %v203_v14 = vsel %vm192_vm0, %v202_v13, 0.0 }
  0x2d   : > { %v204_v15 = vrot.slane %v203_v14, 4 }
  0x2f   : > { %v205_v16 = vadd.f32 %v204_v15, %v203_v14 }
  0x31   : > { %v206_v17 = vrot.slane %v205_v16, 2 }
  0x33   : > { %v207_v18 = vadd.f32 %v206_v17, %v205_v16 }
  0x35   : > { %v208_v19 = vrot.slane %v207_v18, 1 }
  0x37   : > { %v209_v20 = vadd.f32 %v208_v19, %v207_v18 }
  0x39   : > { %v210_v21 = vmul.f32 0.25, %v209_v20 }
  0x3b   : > { %v211_v22 = vadd.f32 1e-05, %v210_v21 }
  0x3d   : > { %383 = vrsqrt.f32 %v211_v22 }
  0x4a   : > { %v384_v23 = vpop.eup %383 }
  0x4b   : > { %v213_v24 = vmul.f32 %v384_v23, %v201_v12 }
  0x91   : > { %v218_v25 = vpop.permute.xlu0 %217 }
  0x92   : > { %v220_v26 = vmul.f32 %v218_v25, %v213_v24 }
  0x95   : > { %v225_v27 = vpop.permute.xlu0 %224 }
  0x96   : > { %v227_v28 = vadd.f32 %v225_v27, %v220_v26 }
  0x98   : > { %228 = vst [vmem:[%s183_s11] sm:$0xf] %v227_v28 }
  0x99   : > { %398 = shalt.err (!%p395_p5)
}
  0x9a   : > { %s399_s30 = scalar_lea.hbm %s242_s23, 64  ;;  %s403_s6 = scalar_lea.hbm %s593_s3, 128 }
  0x9b   : > { %p400_p6 = scmp.ne.s32.totalorder %s242_s23, %s399_s30  ;;  %p404_p10 = scmp.lt.s32.totalorder %s242_s23, %s593_s3 }
  0x9c   : > { %p405_p11 = scmp.lt.s32.totalorder %s403_s6, %s399_s30 }
  0x9d   : > { %p401_p7 = pnand %p400_p6, %p525_p4 }
  0x9e   : > { %p406_p12 = por %p405_p11, %p404_p10 }
  0x9f   : > { %p402_p9 = pneg %p401_p7 }
  0xa1   : > { %p407_p13 = pnand %p406_p12, %p402_p9 }
  0xa3   : > { %410 = shalt.err (!%p407_p13)
}
  0xa4   : > { %326 = dma.vmem_to_hbm [thread:$0]  (%p525_p4), %s245_s18, 64, %s242_s23, %s230_s26  }
  0xa5 PF: > { %p332_p0 = scmp.ge.s32.totalorder %s461_s17, 2  ;;  %s256_s9 = sand.u32 1, %s441_s12  }
  0xa6   : > { %s257_s10 = scalar_lea.sflag [#allocation3], %s256_s9 }
  0xa7   : > { %p329_p1 = pnand %p332_p0, %p532_p8 }
  0xa9   : > { %p330_p2 = pneg %p329_p1 }
  0xab   : > { %436 = dma.done.wait (%p330_p2), %s257_s10, 64  }
  0xac   : > { %438 = vsyncadd (%p330_p2), %s257_s10, 4294967232  ;;  %s16_s17 = sadd.s32 1, %s461_s17   ;;  %s596_s12 = smov %s445_s13 }
  0xad   : > { %p13_p3 = scmp.ge.s32.totalorder %s16_s17, 4   ;;  %s597_s13 = smov %s449_s14 }
  0xae   : > { %s598_s14 = smov %s538_s25  ;;  %s599_s15 = smov %s457_s16 }
  0xaf   : > { %s600_s16 = smov %s602_s20  ;;  %15 = sbr.rel (!%p13_p3) target bundleno = 4 (0x4), region = 67 }
  0xb4   :  { %262 = vsyncpa [#allocation3], 1 }
  0xb5   :  { %264 = vsyncpa [#allocation3 + $0x1], 1 }

</bundles_post_ra>
